<compile_context>
chip_gen: v7x
topology: tpu7x:2x2x1
jax: 0.10.0
libtpu: 0.0.40
codegen_flags: <defaults>
</compile_context>

<pallas_src>
import numpy as np
import jax
import jax.numpy as jnp
from jax.experimental import pallas as pl
from jax.experimental.pallas import tpu as pltpu

LEAKY_SLOPE = 0.2
ATTN_HEAD = 8          # SelfAttention(64): query/key out_features = 64 // 8
MAX_TILE_B = 512       # batch tile for large-batch pipelining


def _kernel(z_ref, c_ref, wz_ref, wc_ref, wmid_ref, bvec_ref, b3_ref, out_ref):
    z = z_ref[...]                     # (TB, L)
    c = c_ref[...]                     # (TB, C)

    b1 = bvec_ref[0:1, :]              # (1, 64)  b1 + bc @ W1_c   (folded)
    bmid = bvec_ref[1:2, 0:32]         # (1, 32)  (gamma*bv)@W2 + b2 (folded)

    # first main Linear with the concat + cond_proj algebraically eliminated
    h = (jnp.dot(z, wz_ref[...], preferred_element_type=jnp.float32)
         + jnp.dot(c, wc_ref[...], preferred_element_type=jnp.float32) + b1)
    h = jnp.where(h > 0, h, LEAKY_SLOPE * h)

    # SelfAttention (length-1 seq => exact residual value-proj) fused with Linear(64,32):
    #   h2 = leaky( h @ ((I + gamma*Wv) @ W2) + ((gamma*bv) @ W2 + b2) )
    h2 = jnp.dot(h, wmid_ref[0:64, :], preferred_element_type=jnp.float32) + bmid
    h2 = jnp.where(h2 > 0, h2, LEAKY_SLOPE * h2)

    # Linear(32, 1) as elementwise multiply + cross-lane (XLU) reduction; b3 from SMEM.
    w3_row = wmid_ref[64:65, :]        # (1, 32)
    out_ref[...] = jnp.sum(h2 * w3_row, axis=-1, keepdims=True) + b3_ref[0, 0]


def prepare_params(params, latent_dim, cond_dim):
    """One-time host-side folding + packing (hoisted out of the per-call path)."""
    HI = jax.lax.Precision.HIGHEST
    L = latent_dim

    w1_z = params["w1"][:L, :]                                   # (L, 64)
    w1_c = params["w1"][L:, :]                                   # (32, 64)

    # fold cond_proj (Linear) into the first main Linear (pure linear chain)
    wc_fold = jnp.dot(params["wc"], w1_c, precision=HI)          # (C, 64)
    b1_fold = params["b1"] + jnp.dot(params["bc"], w1_c, precision=HI)

    # fold attention residual value projection + Linear(64,32) into one matmul
    eye = jnp.eye(64, dtype=jnp.float32)
    w_mid = jnp.dot(eye + params["gamma"] * params["wv"], params["w2"], precision=HI)
    b_mid = jnp.dot(params["gamma"] * params["bv"], params["w2"], precision=HI) + params["b2"]

    # pack W_mid and w3 into one slab; row offsets 0 and 64 are 8-aligned, padded to 72 rows
    wmid_slab = jnp.zeros((72, 32), jnp.float32)
    wmid_slab = wmid_slab.at[0:64, :].set(w_mid)
    wmid_slab = wmid_slab.at[64:65, :].set(params["w3"].T)       # (1, 32)

    # bias slab: row 0 = b1_fold (64 lanes), row 1 = [b_mid | zeros] (lane offset 0)
    bvec = jnp.zeros((8, 64), jnp.float32)
    bvec = bvec.at[0:1, :].set(b1_fold)
    bvec = bvec.at[1:2, 0:32].set(b_mid)

    b3 = params["b3"].reshape(1, 1).astype(jnp.float32)          # SMEM scalar

    return (jnp.asarray(w1_z, jnp.float32),
            jnp.asarray(wc_fold, jnp.float32),
            wmid_slab, bvec, b3)


def sn_discriminator(z, c, packed):
    """Per-call path: a single pallas_call on pre-packed parameters."""
    wz, wc, wmid_slab, bvec, b3 = packed
    B, L = z.shape
    C = c.shape[1]

    TB = B if B <= MAX_TILE_B else MAX_TILE_B
    nb = pl.cdiv(B, TB)
    Bp = nb * TB
    if Bp != B:                                    # static (Python-level) check
        z = jnp.pad(z, ((0, Bp - B), (0, 0)))
        c = jnp.pad(c, ((0, Bp - B), (0, 0)))

    const = lambda i: (0, 0)                       # weight slabs stay VMEM-resident
    out = pl.pallas_call(
        _kernel,
        out_shape=jax.ShapeDtypeStruct((Bp, 1), jnp.float32),
        grid=(nb,),
        in_specs=[
            pl.BlockSpec((TB, L), lambda i: (i, 0)),       # z tile
            pl.BlockSpec((TB, C), lambda i: (i, 0)),       # c tile
            pl.BlockSpec((L, 64), const),                  # Wz
            pl.BlockSpec((C, 64), const),                  # Wc (folded)
            pl.BlockSpec((72, 32), const),                 # [W_mid ; w3.T ; pad]
            pl.BlockSpec((8, 64), const),                  # [b1 ; b_mid|0 ; pad]
            pl.BlockSpec(memory_space=pltpu.MemorySpace.SMEM),  # b3 scalar
        ],
        out_specs=pl.BlockSpec((TB, 1), lambda i: (i, 0)),
        compiler_params=pltpu.CompilerParams(
            dimension_semantics=("parallel",)),
    )(z, c, wz, wc, wmid_slab, bvec, b3)

    return out[:B] if Bp != B else out


def _spectral_normalize(w):
    """Exact spectral normalization (fixed point of PyTorch's power iteration)."""
    w_np = np.asarray(w)
    sigma = np.linalg.svd(w_np, compute_uv=False)[0]
    return jnp.asarray(w_np / sigma, dtype=jnp.float32)


def init_params(key, latent_dim, cond_dim):
    """Deterministic synthetic parameters; weights stored as (in_features, out_features)."""
    keys = iter(jax.random.split(key, 20))

    def mat(shape, scale=0.3):
        return scale * jax.random.normal(next(keys), shape, dtype=jnp.float32)

    p = {}
    p["wc"] = _spectral_normalize(mat((cond_dim, 32)))          # cond_proj (SN)
    p["bc"] = mat((1, 32))
    p["w1"] = _spectral_normalize(mat((latent_dim + 32, 64)))   # main[0] (SN)
    p["b1"] = mat((1, 64))
    p["wq"] = mat((64, ATTN_HEAD)); p["bq"] = mat((1, ATTN_HEAD))   # SelfAttention (no SN)
    p["wk"] = mat((64, ATTN_HEAD)); p["bk"] = mat((1, ATTN_HEAD))
    p["wv"] = mat((64, 64));        p["bv"] = mat((1, 64))
    # nn.Parameter(torch.zeros(1)) in the module; set nonzero here so the attention
    # residual path is actually exercised by the test.
    p["gamma"] = jnp.float32(0.35)
    p["w2"] = _spectral_normalize(mat((64, 32)))                # main[3] (SN)
    p["b2"] = mat((1, 32))
    p["w3"] = _spectral_normalize(mat((32, 1)))                 # main[5] (SN)
    p["b3"] = mat((1, 1))
    return p


def reference_forward(z, c, p):
    """Plain-JAX mirror of the PyTorch forward (unfused, full SelfAttention path)."""
    HI = jax.lax.Precision.HIGHEST
    B = z.shape[0]
    c_proj = jnp.dot(c, p["wc"], precision=HI) + p["bc"]
    x = jnp.concatenate([z, c_proj], axis=1)
    h = jnp.dot(x, p["w1"], precision=HI) + p["b1"]
    h = jnp.where(h > 0, h, LEAKY_SLOPE * h)
    # SelfAttention(64) on a (B, 64) tensor -> sequence length 1
    q = (jnp.dot(h, p["wq"], precision=HI) + p["bq"]).reshape(B, 1, ATTN_HEAD)
    k = (jnp.dot(h, p["wk"], precision=HI) + p["bk"]).reshape(B, 1, ATTN_HEAD)
    v = (jnp.dot(h, p["wv"], precision=HI) + p["bv"]).reshape(B, 1, 64)
    scores = jnp.einsum("bij,bkj->bik", q, k, precision=HI) / (ATTN_HEAD ** 0.5)
    attn = jax.nn.softmax(scores, axis=-1)
    out = jnp.einsum("bik,bkd->bid", attn, v, precision=HI).reshape(B, 64)
    h = p["gamma"] * out + h
    h2 = jnp.dot(h, p["w2"], precision=HI) + p["b2"]
    h2 = jnp.where(h2 > 0, h2, LEAKY_SLOPE * h2)
    return jnp.dot(h2, p["w3"], precision=HI) + p["b3"]


if __name__ == "__main__":
    key = jax.random.PRNGKey(0)
    batch, latent_dim, cond_dim = 8, 16, 8

    kz, kc, kp = jax.random.split(key, 3)
    z = jax.random.normal(kz, (batch, latent_dim), dtype=jnp.float32)
    c = jax.random.normal(kc, (batch, cond_dim), dtype=jnp.float32)
    params = init_params(kp, latent_dim, cond_dim)

    packed = prepare_params(params, latent_dim, cond_dim)   # one-time packing
    packed = jax.block_until_ready(packed)

    out = sn_discriminator(z, c, packed)
    out = jax.block_until_ready(out)

    ref = reference_forward(z, c, params)
    assert out.shape == (batch, 1) and out.dtype == jnp.float32
    np.testing.assert_allclose(np.asarray(out), np.asarray(ref), rtol=1e-3, atol=1e-3)
    print("KERNEL_OK")
</pallas_src>

<mosaic_0001>
module attributes {stable_mosaic.version = 11 : i64} {
  func.func @_kernel(%arg0: i32, %arg1: memref<8x16xf32, #tpu.memory_space<vmem>>, %arg2: memref<8x8xf32, #tpu.memory_space<vmem>>, %arg3: memref<16x64xf32, #tpu.memory_space<vmem>>, %arg4: memref<8x64xf32, #tpu.memory_space<vmem>>, %arg5: memref<72x32xf32, #tpu.memory_space<vmem>>, %arg6: memref<8x64xf32, #tpu.memory_space<vmem>>, %arg7: memref<1x1xf32, #tpu.memory_space<smem>>, %arg8: memref<8x1xf32, #tpu.memory_space<vmem>>) attributes {dimension_semantics = [#tpu.dimension_semantics<parallel>], iteration_bounds = array<i64: 1>, scalar_prefetch = 0 : i64, scratch_operands = 0 : i64, tpu.core_type = #tpu.core_type<tc>, window_params = [{transform_indices = @transform_0, window_bounds = array<i64: 8, 16>}, {transform_indices = @transform_1, window_bounds = array<i64: 8, 8>}, {pipeline_mode = #tpu.pipeline_mode<synchronous>, transform_indices = @transform_2, window_bounds = array<i64: 16, 64>}, {pipeline_mode = #tpu.pipeline_mode<synchronous>, transform_indices = @transform_3, window_bounds = array<i64: 8, 64>}, {pipeline_mode = #tpu.pipeline_mode<synchronous>, transform_indices = @transform_4, window_bounds = array<i64: 72, 32>}, {pipeline_mode = #tpu.pipeline_mode<synchronous>, transform_indices = @transform_5, window_bounds = array<i64: 8, 64>}, {transform_indices = @transform_6, window_bounds = array<i64: 1, 1>}, {transform_indices = @transform_7, window_bounds = array<i64: 8, 1>}]} {
    %c0 = arith.constant 0 : index
    %c0_0 = arith.constant 0 : index
    %0 = vector.load %arg1[%c0, %c0_0] : memref<8x16xf32, #tpu.memory_space<vmem>>, vector<8x16xf32>
    %c0_1 = arith.constant 0 : index
    %c0_2 = arith.constant 0 : index
    %1 = vector.load %arg2[%c0_1, %c0_2] : memref<8x8xf32, #tpu.memory_space<vmem>>, vector<8x8xf32>
    %c0_3 = arith.constant 0 : index
    %c0_4 = arith.constant 0 : index
    %2 = vector.load %arg6[%c0_3, %c0_4] : memref<8x64xf32, #tpu.memory_space<vmem>>, vector<1x64xf32>
    %c1 = arith.constant 1 : index
    %c0_5 = arith.constant 0 : index
    %3 = vector.load %arg6[%c1, %c0_5] : memref<8x64xf32, #tpu.memory_space<vmem>>, vector<1x32xf32>
    %c0_6 = arith.constant 0 : index
    %c0_7 = arith.constant 0 : index
    %4 = vector.load %arg3[%c0_6, %c0_7] : memref<16x64xf32, #tpu.memory_space<vmem>>, vector<16x64xf32>
    %cst = arith.constant dense<0.000000e+00> : vector<8x64xf32>
    %5 = tpu.matmul %0, %4, %cst {dimension_numbers = #tpu.dot_dimension_numbers<[1], [0], [0], [1], [0, 0, 1, 1], [], []>} : vector<8x16xf32>, vector<16x64xf32>, vector<8x64xf32> -> vector<8x64xf32>
    %c0_8 = arith.constant 0 : index
    %c0_9 = arith.constant 0 : index
    %6 = vector.load %arg4[%c0_8, %c0_9] : memref<8x64xf32, #tpu.memory_space<vmem>>, vector<8x64xf32>
    %cst_10 = arith.constant dense<0.000000e+00> : vector<8x64xf32>
    %7 = tpu.matmul %1, %6, %cst_10 {dimension_numbers = #tpu.dot_dimension_numbers<[1], [0], [0], [1], [0, 0, 1, 1], [], []>} : vector<8x8xf32>, vector<8x64xf32>, vector<8x64xf32> -> vector<8x64xf32>
    %8 = arith.addf %5, %7 : vector<8x64xf32>
    %9 = vector.broadcast %2 : vector<1x64xf32> to vector<8x64xf32>
    %10 = arith.addf %8, %9 : vector<8x64xf32>
    %cst_11 = arith.constant 0.000000e+00 : f32
    %11 = vector.broadcast %cst_11 : f32 to vector<8x64xf32>
    %12 = arith.cmpf ogt, %10, %11 : vector<8x64xf32>
    %cst_12 = arith.constant 2.000000e-01 : f32
    %13 = vector.broadcast %cst_12 : f32 to vector<8x64xf32>
    %14 = arith.mulf %13, %10 : vector<8x64xf32>
    %15 = arith.select %12, %10, %14 : vector<8x64xi1>, vector<8x64xf32>
    %c0_13 = arith.constant 0 : index
    %c0_14 = arith.constant 0 : index
    %16 = vector.load %arg5[%c0_13, %c0_14] : memref<72x32xf32, #tpu.memory_space<vmem>>, vector<64x32xf32>
    %cst_15 = arith.constant dense<0.000000e+00> : vector<8x32xf32>
    %17 = tpu.matmul %15, %16, %cst_15 {dimension_numbers = #tpu.dot_dimension_numbers<[1], [0], [0], [1], [0, 0, 1, 1], [], []>} : vector<8x64xf32>, vector<64x32xf32>, vector<8x32xf32> -> vector<8x32xf32>
    %18 = vector.broadcast %3 : vector<1x32xf32> to vector<8x32xf32>
    %19 = arith.addf %17, %18 : vector<8x32xf32>
    %cst_16 = arith.constant 0.000000e+00 : f32
    %20 = vector.broadcast %cst_16 : f32 to vector<8x32xf32>
    %21 = arith.cmpf ogt, %19, %20 : vector<8x32xf32>
    %cst_17 = arith.constant 2.000000e-01 : f32
    %22 = vector.broadcast %cst_17 : f32 to vector<8x32xf32>
    %23 = arith.mulf %22, %19 : vector<8x32xf32>
    %24 = arith.select %21, %19, %23 : vector<8x32xi1>, vector<8x32xf32>
    %c64 = arith.constant 64 : index
    %c0_18 = arith.constant 0 : index
    %25 = vector.load %arg5[%c64, %c0_18] : memref<72x32xf32, #tpu.memory_space<vmem>>, vector<1x32xf32>
    %26 = vector.broadcast %25 : vector<1x32xf32> to vector<8x32xf32>
    %27 = arith.mulf %24, %26 : vector<8x32xf32>
    %cst_19 = arith.constant dense<0.000000e+00> : vector<8xf32>
    %28 = vector.multi_reduction <add>, %27, %cst_19 [1] : vector<8x32xf32> to vector<8xf32>
    %29 = vector.shape_cast %28 : vector<8xf32> to vector<8x1xf32>
    %c0_20 = arith.constant 0 : index
    %c0_21 = arith.constant 0 : index
    %30 = memref.load %arg7[%c0_20, %c0_21] : memref<1x1xf32, #tpu.memory_space<smem>>
    %31 = vector.broadcast %30 : f32 to vector<8x1xf32>
    %32 = arith.addf %29, %31 : vector<8x1xf32>
    %c0_22 = arith.constant 0 : index
    %c0_23 = arith.constant 0 : index
    %33 = vector.load %arg8[%c0_22, %c0_23] : memref<8x1xf32, #tpu.memory_space<vmem>>, vector<8x1xf32>
    tpu.vector_store %arg8[%c0_22, %c0_23], %32 {strides = array<i32>} : memref<8x1xf32, #tpu.memory_space<vmem>>, vector<8x1xf32>,
    return
  }
  func.func @transform_0(%arg0: i32) -> (i32, i32) {
    %c0_i32 = arith.constant 0 : i32
    %c0_i32_0 = arith.constant 0 : i32
    return %arg0, %c0_i32 : i32, i32
  }
  func.func @transform_1(%arg0: i32) -> (i32, i32) {
    %c0_i32 = arith.constant 0 : i32
    %c0_i32_0 = arith.constant 0 : i32
    return %arg0, %c0_i32 : i32, i32
  }
  func.func @transform_2(%arg0: i32) -> (i32, i32) {
    %c0_i32 = arith.constant 0 : i32
    %c0_i32_0 = arith.constant 0 : i32
    %c0_i32_1 = arith.constant 0 : i32
    return %c0_i32, %c0_i32_0 : i32, i32
  }
  func.func @transform_3(%arg0: i32) -> (i32, i32) {
    %c0_i32 = arith.constant 0 : i32
    %c0_i32_0 = arith.constant 0 : i32
    %c0_i32_1 = arith.constant 0 : i32
    return %c0_i32, %c0_i32_0 : i32, i32
  }
  func.func @transform_4(%arg0: i32) -> (i32, i32) {
    %c0_i32 = arith.constant 0 : i32
    %c0_i32_0 = arith.constant 0 : i32
    %c0_i32_1 = arith.constant 0 : i32
    return %c0_i32, %c0_i32_0 : i32, i32
  }
  func.func @transform_5(%arg0: i32) -> (i32, i32) {
    %c0_i32 = arith.constant 0 : i32
    %c0_i32_0 = arith.constant 0 : i32
    %c0_i32_1 = arith.constant 0 : i32
    return %c0_i32, %c0_i32_0 : i32, i32
  }
  func.func @transform_6(%arg0: i32) -> (i32, i32) {
    %c0_i32 = arith.constant 0 : i32
    %c0_i32_0 = arith.constant 0 : i32
    %c0_i32_1 = arith.constant 0 : i32
    return %c0_i32, %c0_i32_0 : i32, i32
  }
  func.func @transform_7(%arg0: i32) -> (i32, i32) {
    %c0_i32 = arith.constant 0 : i32
    %c0_i32_0 = arith.constant 0 : i32
    return %arg0, %c0_i32 : i32, i32
  }
}

</mosaic_0001>

<bundles_post_ra>
// kernel: tpu_custom_call.1
= control target key start
LH: loop header
LB: loop body
LE: loop exit
PB: predicated region body
PF: predicated region fallthrough
CT: control target
= control target key end

     0   :  { %vm34_vm0 = vcmask 64512   ;;  %v367_v0 = vmov 0.0   ;;  %vm368_vm1 = vmmov 0   ;;  %v369_v5 = vmov 0.0|0.0   ;;  %s468_s3 = inlined_call_operand.vmem [shape: f32[8,64], index: 3, kind: input, shape index: {}]   ;;  %s469_s1 = inlined_call_operand.vmem [shape: f32[8,8], index: 1, kind: input, shape index: {}]   ;;  %s470_s2 = inlined_call_operand.vmem [shape: f32[16,64], index: 2, kind: input, shape index: {}]   ;;  %s471_s4 = inlined_call_operand.vmem [shape: f32[72,32], index: 4, kind: input, shape index: {}]   ;;  %s472_s0 = inlined_call_operand.vmem [shape: f32[8,16], index: 0, kind: input, shape index: {}]   ;;  %s473_s5 = inlined_call_operand.vmem [shape: f32[8,64], index: 5, kind: input, shape index: {}]   ;;  %s474_s6 = inlined_call_operand.<no memory space> [shape: f32[1,1], index: 6, kind: input, shape index: {}]   ;;  %s475_s7 = inlined_call_operand.vmem [shape: f32[8,1], index: 7, kind: output, shape index: {}]  }
   0x1   :  { %318 = vmatprep.subr.mxu1 %v367_v0  ;;  %v33_v1 = vld [vmem:[%s468_s3] sm:$0xff]  ;;  %320 = vmatprep.mubr.msk.f32.mxu1 %vm368_vm1, %v367_v0  ;;  %v32_v4 = vld [vmem:[%s470_s2 + $0x8] sm:$0xff]  ;;  %vm108_vm2 = vcmask 130048   ;;  %v192_v11 = vld [vmem:[%s471_s4 + $0x10] sm:$0xff]  ;;  %vm202_vm4 = vcmask 523264   ;;  %vm285_vm6 = vcmask 261120   ;;  %v290_v38 = vstv %s474_s6 }
   0x2   :  { %v28_v2 = vld [vmem:[%s469_s1] sm:$0xff]  ;;  %319 = vmatpush3.msra.mxu1 %v33_v1  ;;  %352 = vmatprep.subr.bf16.mxu0 %v369_v5  ;;  %v191_v8 = vld [vmem:[%s471_s4 + $0x8] sm:$0xff]  ;;  %v193_v12 = vld [vmem:[%s471_s4 + $0x18] sm:$0xff]  ;;  %vm292_vm7 = vcmask 7168  }
   0x3   :  { %v31_v3 = vld [vmem:[%s470_s2] sm:$0xff]  ;;  %321 = vmatmul.mubr.msk.f32.vlgmr.msra.gmra.mrb[0].mxu1 %vm34_vm0, %v28_v2  ;;  %349 = vmatprep.subr.bf16.mxu1 %v369_v5  ;;  %v356_v13 = vpack.c.bf16 %v193_v12, %v192_v11  ;;  %v195_v15 = vld [vmem:[%s471_s4 + $0x28] sm:$0xff]  ;;  %v196_v17 = vld [vmem:[%s471_s4 + $0x30] sm:$0xff] }
   0x4   :  { %v190_v6 = vld [vmem:[%s471_s4] sm:$0xff]  ;;  %v350_v7 = vpack.c.bf16 %v32_v4, %v31_v3  ;;  %327 = vmatprep.mubr.msk.f32.mxu1 %vm368_vm1, %v367_v0  ;;  %346 = vmatprep.mubr.msk.f32.mxu0 %vm368_vm1, %v367_v0  ;;  %v197_v18 = vld [vmem:[%s471_s4 + $0x38] sm:$0xff] }
   0x5   :  { %v353_v9 = vpack.c.bf16 %v191_v8, %v190_v6  ;;  %v27_v10 = vld [vmem:[%s472_s0] sm:$0xff]  ;;  %v362_v19 = vpack.c.bf16 %v197_v18, %v196_v17 }
   0x6   :  { %351 = vmatpush3.bf16.msra.mxu1 %v350_v7  ;;  %v194_v14 = vld [vmem:[%s471_s4 + $0x20] sm:$0xff] }
   0x7   :  { %354 = vmatpush3.bf16.msra.mxu0 %v353_v9  ;;  %v359_v16 = vpack.c.bf16 %v195_v15, %v194_v14  ;;  %v300_v22 = vld [vmem:[%s473_s5] ss:$0 sm:$0xff]  ;;  %v301_v29 = vld [vmem:[%s473_s5 + $0x1] ss:$0 sm:$0xff] }
   0x8   :  { %355 = vmatprep.subr.bf16.mxu0 %v369_v5  ;;  %v303_v34 = vld [vmem:[%s471_s4 + $0x40] ss:$0 sm:$0xff] }
   0x9   :  { %328 = vmatmul.mubr.msk.f32.vlgmr.msra.gmra.mrb[2].mxu1 %vm108_vm2, %v27_v10 }
   0xb   :  { %357 = vmatpush3.bf16.msra.mxu0 %v356_v13 }
   0xc   :  { %358 = vmatprep.subr.bf16.mxu0 %v369_v5 }
   0xf   :  { %360 = vmatpush3.bf16.msra.mxu0 %v359_v16 }
  0x10   :  { %361 = vmatprep.subr.bf16.mxu0 %v369_v5 }
  0x13   :  { %363 = vmatpush3.bf16.msra.mxu0 %v362_v19 }
  0xd6   :  { %v104_v20 = vpop.f32.mrb[0].mxu1 }
  0xd7   :  { %v322_v21 = vpop.f32.mrb[1].mxu1 }
  0xdc   :  { %v178_v23 = vpop.f32.mrb[2].mxu1 }
  0xdd   :  { %v179_v24 = vadd.f32 %v178_v23, %v104_v20  ;;  %v329_v25 = vpop.f32.mrb[3].mxu1 }
  0xdf   :  { %v186_v26 = vadd.f32 %v300_v22, %v179_v24 }
  0xe1   :  { %v188_v27 = vmul.f32 0.2, %v186_v26  ;;  %vm187_vm3 = vcmp.gt.f32.partialorder %v186_v26, 0.0 }
  0xe3   :  { %v189_v28 = vsel %vm187_vm3, %v186_v26, %v188_v27 }
  0xe4   :  { %347 = vmatmul.mubr.msk.f32.vlgmr.msra.gmra.mrb[0].mxu0 %vm202_vm4, %v189_v28 }
 0x1b7   :  { %v272_v30 = vpop.f32.mrb[0].mxu0 }
 0x1b8   :  { %v273_v31 = vadd.f32 %v301_v29, %v272_v30  ;;  %v348_v32 = vpop.f32.mrb[1].mxu0 }
 0x1ba   :  { %v277_v33 = vmul.f32 0.2, %v273_v31  ;;  %vm276_vm5 = vcmp.gt.f32.partialorder %v273_v31, 0.0 }
 0x1bc   :  { %v278_v35 = vsel %vm276_vm5, %v273_v31, %v277_v33 }
 0x1bd   :  { %v284_v36 = vmul.f32 %v303_v34, %v278_v35 }
 0x1bf   :  { %v286_v37 = vsel %vm285_vm6, %v284_v36, 0.0 }
 0x1c0   :  { %287 = vadd.xlane.f32.xlu0 %v286_v37 }
 0x24d   :  { %v288_v39 = vpop.xlane.xlu0 %287 }
 0x24e   :  { %v291_v40 = vadd.f32 %v290_v38, %v288_v39 }
 0x250   :  { %293 = vst.msk [vmem:[%s475_s7] sm:$0xff] %vm292_vm7, %v291_v40 }

</bundles_post_ra>
